<compile_context>
chip_gen: v6e
topology: v6e:2x2x1
jax: 0.10.0
libtpu: 0.0.40
codegen_flags: <defaults>
</compile_context>

<pallas_src>
import functools

import jax
import jax.numpy as jnp
from jax.experimental import pallas as pl
from jax.experimental.pallas import tpu as pltpu


W = 128        # lane width of every padded slab
MUV_OFF = 64   # lane offset of the mu|logvar / eps window
_SUBL = 16     # bf16 sublane packing: keep batch tiles multiples of 16


def _round_up(n, m):
    return (n + m - 1) // m * m


def _choose_tb(batch):
    """Pick the batch tile: multiple of 16, <=2048, >=2 grid steps when possible (v7x dual
    TensorCore), minimizing padded rows + per-step (~0.35us) overhead."""
    b = _round_up(batch, _SUBL)
    if b <= _SUBL:
        return _SUBL
    candidates = {16, 32, 64, 128, 256, 512, 1024, 2048}
    for parts in (2, 3, 4, 6, 8):
        candidates.add(_round_up(-(-b // parts), _SUBL))
    best_tb, best_cost = None, None
    for tb in sorted(candidates):
        if tb < _SUBL or tb > 2048:
            continue
        steps = -(-b // tb)
        if steps < 2:
            continue                      # keep >=2 steps so v7x's 2nd core has work
        cost = steps * (tb + 64)          # padded rows + step overhead (~64 row-equivs)
        if best_cost is None or cost < best_cost or (cost == best_cost and tb > best_tb):
            best_tb, best_cost = tb, cost
    return best_tb if best_tb is not None else b


def _vae_kernel(z_size, in_ref, w_ref, b_ref, out_ref):
    """One batch tile of the full VAE forward chain on 128-lane-wide zero-padded slabs."""
    x_eps = in_ref[...]                                    # (TB, 128) bf16

    def dense(h, l):
        # bf16 x bf16 operands, f32 MXU accumulation, f32 bias add.
        return jnp.dot(h.astype(jnp.bfloat16), w_ref[l],
                       preferred_element_type=jnp.float32) + b_ref[l]

    # ---- encoder ----
    h = jnp.maximum(dense(x_eps, 0), 0.0)                  # real lanes [:nf0]
    h = jnp.maximum(dense(h, 1), 0.0)                      # real lanes [:nf1]
    mu_lv = dense(h, 2)                                    # mu @ [64:64+z), logvar @ [64+z:64+2z)

    # ---- reparameterize: full-vreg, no lane slicing ----
    lane = jax.lax.broadcasted_iota(jnp.int32, mu_lv.shape, 1)
    eps = x_eps.astype(jnp.float32)                        # eps lives on the logvar lanes (*)
    noise = jnp.exp(mu_lv * 0.5) * eps                     # std*eps on the logvar lanes
    in_logvar = (lane >= MUV_OFF + z_size) & (lane < MUV_OFF + 2 * z_size)
    z_in = jnp.where(in_logvar, noise, mu_lv)              # mu @ mu-lanes, std*eps @ logvar-lanes, 0 else
    # (*) x also sits in this f32 view at lanes [0:n_input), but those lanes take the
    #     mu_lv(=0) branch of the select; w_ref[3]'s h1 rows are duplicated at the mu and
    #     logvar row windows so dot(z_in, w[3]) == (mu + std*eps) @ w_h1 exactly.

    # ---- discriminator / decoder ----
    d = jnp.maximum(dense(z_in, 3), 0.0)                   # real lanes [:nf1]
    d = jnp.maximum(dense(d, 4), 0.0)                      # real lanes [:nf0]
    logits = dense(d, 5)                                   # real lanes [:n_output]

    # Numerically-stable sigmoid: exp + approximate reciprocal both run on the EUP slot,
    # and 1 + exp(-|x|) is in (1, 2] so the approx reciprocal never sees inf.
    e = jnp.exp(-jnp.abs(logits))
    r = pl.reciprocal(1.0 + e, approx=True)
    prob = jnp.where(logits >= 0.0, r, e * r)

    # Single lane-dense (TB, 128) f32 store: prob in lanes [:64), mu|logvar in [64:128).
    out_ref[...] = jnp.where(lane < MUV_OFF, prob, mu_lv)


def pack_params(params):
    """Pack all layers into zero-padded, lane-dense slabs (weights bf16, biases f32) laid
    out so the whole chain runs on full 128-lane vregs with no in-kernel lane slicing:
      w[0]: enc0 rows at [0:n_input)                     (x window of the input slab)
      w[2]: mu|logvar columns at [64:64+2z)              (lands mu/logvar in the output window)
      w[3]: h1 rows duplicated at [64:64+z) and [64+z:64+2z)
    """
    f32 = jnp.float32

    def pad_w(w, row_off=0, col_off=0):
        k, n = w.shape
        assert row_off + k <= W and col_off + n <= W
        return jnp.zeros((W, W), f32).at[row_off:row_off + k, col_off:col_off + n].set(w)

    def pad_b(b, col_off=0):
        n = b.shape[1]
        assert col_off + n <= W
        return jnp.zeros((1, W), f32).at[:, col_off:col_off + n].set(b)

    z_size = params["w_mu"].shape[1]
    assert params["w_enc0"].shape[0] <= MUV_OFF      # n_input  <= 64
    assert params["w_dec1"].shape[1] <= MUV_OFF      # n_output <= 64
    assert 2 * z_size <= W - MUV_OFF                 # mu|logvar window fits

    w_muv = jnp.concatenate([params["w_mu"], params["w_v"]], axis=1)
    b_muv = jnp.concatenate([params["b_mu"], params["b_v"]], axis=1)
    w_h1_dup = jnp.concatenate([params["w_h1"], params["w_h1"]], axis=0)   # (2z, nf1)

    w_slab = jnp.stack([
        pad_w(params["w_enc0"]),
        pad_w(params["w_enc1"]),
        pad_w(w_muv, col_off=MUV_OFF),
        pad_w(w_h1_dup, row_off=MUV_OFF),
        pad_w(params["w_dec0"]),
        pad_w(params["w_dec1"]),
    ]).astype(jnp.bfloat16)            # bf16 MXU operands (f32 accumulation in-kernel)

    b_slab = jnp.stack([
        pad_b(params["b_enc0"]),
        pad_b(params["b_enc1"]),
        pad_b(b_muv, col_off=MUV_OFF),
        pad_b(params["b_h1"]),
        pad_b(params["b_dec0"]),
        pad_b(params["b_dec1"]),
    ])                                 # biases stay f32
    return w_slab, b_slab


def pack_inputs(x, eps):
    """Fuse x and eps into one lane-dense (B, 128) bf16 slab:
    x at lanes [0:n_input), eps at lanes [64+z : 64+2z) (aligned with the logvar window)."""
    B, n_input = x.shape
    z_size = eps.shape[1]
    assert n_input <= MUV_OFF and 2 * z_size <= W - MUV_OFF
    slab = jnp.zeros((B, W), jnp.float32)
    slab = slab.at[:, :n_input].set(x)
    slab = slab.at[:, MUV_OFF + z_size:MUV_OFF + 2 * z_size].set(eps)
    return slab.astype(jnp.bfloat16)


@functools.partial(jax.jit, static_argnames=("z_size", "n_output"))
def vae_forward(in_slab, w_slab, b_slab, *, z_size, n_output):
    """Runs the fused VAE forward; returns (prob, mu, logvar) like VAENet.forward."""
    B = in_slab.shape[0]
    L = w_slab.shape[0]

    TB = _choose_tb(B)
    B_pad = _round_up(B, TB)
    if B_pad != B:
        in_slab = jnp.pad(in_slab, ((0, B_pad - B), (0, 0)))

    # VMEM budget: resident weight/bias slabs + double-buffered in/out tiles + temporaries.
    vmem_bytes = (w_slab.size * w_slab.dtype.itemsize
                  + b_slab.size * b_slab.dtype.itemsize
                  + 2 * TB * W * 2                  # bf16 input slab, double-buffered
                  + 2 * TB * W * 4                  # f32 output slab, double-buffered
                  + 12 * TB * W * 4)                # live activations / compiler temporaries
    vmem_limit = int(min(max(vmem_bytes + (2 << 20), 32 << 20), 64 << 20))

    out_slab = pl.pallas_call(
        functools.partial(_vae_kernel, z_size),
        out_shape=jax.ShapeDtypeStruct((B_pad, W), jnp.float32),
        grid=(B_pad // TB,),
        in_specs=[
            pl.BlockSpec((TB, W), lambda i: (i, 0)),        # fused x|eps slab: blocked over batch
            pl.BlockSpec((L, W, W), lambda i: (0, 0, 0)),   # weights: VMEM-resident
            pl.BlockSpec((L, 1, W), lambda i: (0, 0, 0)),   # biases:  VMEM-resident
        ],
        out_specs=pl.BlockSpec((TB, W), lambda i: (i, 0)),  # fused prob|mu|logvar slab
        compiler_params=pltpu.CompilerParams(
            dimension_semantics=("parallel",),              # batch axis -> megacore / v7x 2xTC
            vmem_limit_bytes=vmem_limit),
    )(in_slab, w_slab, b_slab)

    prob = out_slab[:B, :n_output]
    mu = out_slab[:B, MUV_OFF:MUV_OFF + z_size]
    logvar = out_slab[:B, MUV_OFF + z_size:MUV_OFF + 2 * z_size]
    return prob, mu, logvar


def init_params(key, n_input, n_features, z_size, n_output):
    """Deterministic init mimicking PyTorch nn.Linear default (uniform +-1/sqrt(fan_in)).
    Weights are stored transposed: (in, out)."""
    if isinstance(n_features, int):
        n_features = [n_features, n_features // 2]

    layer_dims = {
        "enc0": (n_input, n_features[0]),
        "enc1": (n_features[0], n_features[1]),
        "mu": (n_features[1], z_size),
        "v": (n_features[1], z_size),
        "h1": (z_size, n_features[1]),
        "dec0": (n_features[1], n_features[0]),
        "dec1": (n_features[0], n_output),
    }

    params = {}
    keys = jax.random.split(key, 2 * len(layer_dims))
    for i, (name, (fan_in, fan_out)) in enumerate(layer_dims.items()):
        bound = 1.0 / jnp.sqrt(jnp.float32(fan_in))
        w = jax.random.uniform(keys[2 * i], (fan_in, fan_out), jnp.float32, -bound, bound)
        b = jax.random.uniform(keys[2 * i + 1], (1, fan_out), jnp.float32, -bound, bound)
        params[f"w_{name}"] = w
        params[f"b_{name}"] = b
    return params


def reference_forward(x, eps, params):
    """Pure-JAX f32 reference for the sanity check."""
    relu = lambda v: jnp.maximum(v, 0.0)
    h = relu(x @ params["w_enc0"] + params["b_enc0"])
    h = relu(h @ params["w_enc1"] + params["b_enc1"])
    mu = h @ params["w_mu"] + params["b_mu"]
    logvar = h @ params["w_v"] + params["b_v"]
    z = mu + jnp.exp(logvar / 2.0) * eps
    d = relu(z @ params["w_h1"] + params["b_h1"])
    d = relu(d @ params["w_dec0"] + params["b_dec0"])
    prob = jax.nn.sigmoid(d @ params["w_dec1"] + params["b_dec1"])
    return prob, mu, logvar


if __name__ == "__main__":
    # Small shapes consistent with the module: VAENet(input_shape=(16,),
    # output_shape=(16,), n_features=32, z_size=8), batch of 8.
    batch = 8
    n_input = 16
    n_features = 32          # -> [32, 16]
    z_size = 8
    n_output = 16

    key = jax.random.PRNGKey(0)
    k_param, k_x, k_eps = jax.random.split(key, 3)

    params = init_params(k_param, n_input, n_features, z_size, n_output)
    w_slab, b_slab = pack_params(params)

    # Round test inputs to bf16-representable values so the kernel (bf16 operands) and the
    # f32 reference consume identical x / eps; remaining diff = bf16 weights/activations.
    x = jax.random.normal(k_x, (batch, n_input), jnp.float32)
    x = x.astype(jnp.bfloat16).astype(jnp.float32)
    eps = jax.random.normal(k_eps, (batch, z_size), jnp.float32)
    eps = eps.astype(jnp.bfloat16).astype(jnp.float32)

    in_slab = pack_inputs(x, eps)
    prob, mu, logvar = vae_forward(in_slab, w_slab, b_slab,
                                   z_size=z_size, n_output=n_output)
    jax.block_until_ready((prob, mu, logvar))

    # correctness check against the pure-JAX f32 reference
    prob_r, mu_r, logvar_r = reference_forward(x, eps, params)
    assert prob.shape == (batch, n_output) and mu.shape == (batch, z_size)
    # bf16 MXU operands (f32 accumulation) + EUP approx reciprocal -> loosened tolerances.
    assert jnp.allclose(mu, mu_r, atol=2.5e-2), "mu mismatch"
    assert jnp.allclose(logvar, logvar_r, atol=2.5e-2), "logvar mismatch"
    assert jnp.allclose(prob, prob_r, atol=2.5e-2), "prob mismatch"

    print("KERNEL_OK")
</pallas_src>

<mosaic_0001>
module attributes {stable_mosaic.version = 11 : i64} {
  func.func @_vae_kernel(%arg0: i32, %arg1: memref<16x128xbf16, #tpu.memory_space<vmem>>, %arg2: memref<6x128x128xbf16, #tpu.memory_space<vmem>>, %arg3: memref<6x1x128xf32, #tpu.memory_space<vmem>>, %arg4: memref<16x128xf32, #tpu.memory_space<vmem>>) attributes {dimension_semantics = [#tpu.dimension_semantics<parallel>], iteration_bounds = array<i64: 1>, scalar_prefetch = 0 : i64, scratch_operands = 0 : i64, tpu.core_type = #tpu.core_type<tc>, window_params = [{transform_indices = @transform_0, window_bounds = array<i64: 16, 128>}, {pipeline_mode = #tpu.pipeline_mode<synchronous>, transform_indices = @transform_1, window_bounds = array<i64: 6, 128, 128>}, {pipeline_mode = #tpu.pipeline_mode<synchronous>, transform_indices = @transform_2, window_bounds = array<i64: 6, 1, 128>}, {transform_indices = @transform_3, window_bounds = array<i64: 16, 128>}]} {
    %c0 = arith.constant 0 : index
    %c0_0 = arith.constant 0 : index
    %0 = vector.load %arg1[%c0, %c0_0] : memref<16x128xbf16, #tpu.memory_space<vmem>>, vector<16x128xbf16>
    %c0_1 = arith.constant 0 : index
    %c0_2 = arith.constant 0 : index
    %c0_3 = arith.constant 0 : index
    %1 = vector.load %arg2[%c0_1, %c0_2, %c0_3] : memref<6x128x128xbf16, #tpu.memory_space<vmem>>, vector<1x128x128xbf16>
    %2 = vector.shape_cast %1 : vector<1x128x128xbf16> to vector<128x128xbf16>
    %cst = arith.constant dense<0.000000e+00> : vector<16x128xf32>
    %3 = tpu.matmul %0, %2, %cst {dimension_numbers = #tpu.dot_dimension_numbers<[1], [0], [0], [1], [0, 0, 1, 1], [], []>} : vector<16x128xbf16>, vector<128x128xbf16>, vector<16x128xf32> -> vector<16x128xf32>
    %c0_4 = arith.constant 0 : index
    %c0_5 = arith.constant 0 : index
    %c0_6 = arith.constant 0 : index
    %4 = vector.load %arg3[%c0_4, %c0_5, %c0_6] : memref<6x1x128xf32, #tpu.memory_space<vmem>>, vector<1x1x128xf32>
    %5 = vector.shape_cast %4 : vector<1x1x128xf32> to vector<1x128xf32>
    %6 = vector.broadcast %5 : vector<1x128xf32> to vector<16x128xf32>
    %7 = arith.addf %3, %6 : vector<16x128xf32>
    %cst_7 = arith.constant 0.000000e+00 : f32
    %8 = vector.broadcast %cst_7 : f32 to vector<16x128xf32>
    %9 = arith.maximumf %7, %8 : vector<16x128xf32>
    %10 = arith.truncf %9 : vector<16x128xf32> to vector<16x128xbf16>
    %c1 = arith.constant 1 : index
    %c0_8 = arith.constant 0 : index
    %c0_9 = arith.constant 0 : index
    %11 = vector.load %arg2[%c1, %c0_8, %c0_9] : memref<6x128x128xbf16, #tpu.memory_space<vmem>>, vector<1x128x128xbf16>
    %12 = vector.shape_cast %11 : vector<1x128x128xbf16> to vector<128x128xbf16>
    %cst_10 = arith.constant dense<0.000000e+00> : vector<16x128xf32>
    %13 = tpu.matmul %10, %12, %cst_10 {dimension_numbers = #tpu.dot_dimension_numbers<[1], [0], [0], [1], [0, 0, 1, 1], [], []>} : vector<16x128xbf16>, vector<128x128xbf16>, vector<16x128xf32> -> vector<16x128xf32>
    %c1_11 = arith.constant 1 : index
    %c0_12 = arith.constant 0 : index
    %c0_13 = arith.constant 0 : index
    %14 = vector.load %arg3[%c1_11, %c0_12, %c0_13] : memref<6x1x128xf32, #tpu.memory_space<vmem>>, vector<1x1x128xf32>
    %15 = vector.shape_cast %14 : vector<1x1x128xf32> to vector<1x128xf32>
    %16 = vector.broadcast %15 : vector<1x128xf32> to vector<16x128xf32>
    %17 = arith.addf %13, %16 : vector<16x128xf32>
    %cst_14 = arith.constant 0.000000e+00 : f32
    %18 = vector.broadcast %cst_14 : f32 to vector<16x128xf32>
    %19 = arith.maximumf %17, %18 : vector<16x128xf32>
    %20 = arith.truncf %19 : vector<16x128xf32> to vector<16x128xbf16>
    %c2 = arith.constant 2 : index
    %c0_15 = arith.constant 0 : index
    %c0_16 = arith.constant 0 : index
    %21 = vector.load %arg2[%c2, %c0_15, %c0_16] : memref<6x128x128xbf16, #tpu.memory_space<vmem>>, vector<1x128x128xbf16>
    %22 = vector.shape_cast %21 : vector<1x128x128xbf16> to vector<128x128xbf16>
    %cst_17 = arith.constant dense<0.000000e+00> : vector<16x128xf32>
    %23 = tpu.matmul %20, %22, %cst_17 {dimension_numbers = #tpu.dot_dimension_numbers<[1], [0], [0], [1], [0, 0, 1, 1], [], []>} : vector<16x128xbf16>, vector<128x128xbf16>, vector<16x128xf32> -> vector<16x128xf32>
    %c2_18 = arith.constant 2 : index
    %c0_19 = arith.constant 0 : index
    %c0_20 = arith.constant 0 : index
    %24 = vector.load %arg3[%c2_18, %c0_19, %c0_20] : memref<6x1x128xf32, #tpu.memory_space<vmem>>, vector<1x1x128xf32>
    %25 = vector.shape_cast %24 : vector<1x1x128xf32> to vector<1x128xf32>
    %26 = vector.broadcast %25 : vector<1x128xf32> to vector<16x128xf32>
    %27 = arith.addf %23, %26 : vector<16x128xf32>
    %28 = tpu.iota {dimensions = array<i32: 1>} : vector<16x128xi32>
    %29 = arith.extf %0 : vector<16x128xbf16> to vector<16x128xf32>
    %cst_21 = arith.constant 5.000000e-01 : f32
    %30 = vector.broadcast %cst_21 : f32 to vector<16x128xf32>
    %31 = arith.mulf %27, %30 : vector<16x128xf32>
    %32 = math.exp %31 : vector<16x128xf32>
    %33 = arith.mulf %32, %29 : vector<16x128xf32>
    %c72_i32 = arith.constant 72 : i32
    %34 = vector.broadcast %c72_i32 : i32 to vector<16x128xi32>
    %35 = arith.cmpi sge, %28, %34 : vector<16x128xi32>
    %c80_i32 = arith.constant 80 : i32
    %36 = vector.broadcast %c80_i32 : i32 to vector<16x128xi32>
    %37 = arith.cmpi slt, %28, %36 : vector<16x128xi32>
    %38 = arith.andi %35, %37 : vector<16x128xi1>
    %39 = arith.select %38, %33, %27 : vector<16x128xi1>, vector<16x128xf32>
    %40 = arith.truncf %39 : vector<16x128xf32> to vector<16x128xbf16>
    %c3 = arith.constant 3 : index
    %c0_22 = arith.constant 0 : index
    %c0_23 = arith.constant 0 : index
    %41 = vector.load %arg2[%c3, %c0_22, %c0_23] : memref<6x128x128xbf16, #tpu.memory_space<vmem>>, vector<1x128x128xbf16>
    %42 = vector.shape_cast %41 : vector<1x128x128xbf16> to vector<128x128xbf16>
    %cst_24 = arith.constant dense<0.000000e+00> : vector<16x128xf32>
    %43 = tpu.matmul %40, %42, %cst_24 {dimension_numbers = #tpu.dot_dimension_numbers<[1], [0], [0], [1], [0, 0, 1, 1], [], []>} : vector<16x128xbf16>, vector<128x128xbf16>, vector<16x128xf32> -> vector<16x128xf32>
    %c3_25 = arith.constant 3 : index
    %c0_26 = arith.constant 0 : index
    %c0_27 = arith.constant 0 : index
    %44 = vector.load %arg3[%c3_25, %c0_26, %c0_27] : memref<6x1x128xf32, #tpu.memory_space<vmem>>, vector<1x1x128xf32>
    %45 = vector.shape_cast %44 : vector<1x1x128xf32> to vector<1x128xf32>
    %46 = vector.broadcast %45 : vector<1x128xf32> to vector<16x128xf32>
    %47 = arith.addf %43, %46 : vector<16x128xf32>
    %cst_28 = arith.constant 0.000000e+00 : f32
    %48 = vector.broadcast %cst_28 : f32 to vector<16x128xf32>
    %49 = arith.maximumf %47, %48 : vector<16x128xf32>
    %50 = arith.truncf %49 : vector<16x128xf32> to vector<16x128xbf16>
    %c4 = arith.constant 4 : index
    %c0_29 = arith.constant 0 : index
    %c0_30 = arith.constant 0 : index
    %51 = vector.load %arg2[%c4, %c0_29, %c0_30] : memref<6x128x128xbf16, #tpu.memory_space<vmem>>, vector<1x128x128xbf16>
    %52 = vector.shape_cast %51 : vector<1x128x128xbf16> to vector<128x128xbf16>
    %cst_31 = arith.constant dense<0.000000e+00> : vector<16x128xf32>
    %53 = tpu.matmul %50, %52, %cst_31 {dimension_numbers = #tpu.dot_dimension_numbers<[1], [0], [0], [1], [0, 0, 1, 1], [], []>} : vector<16x128xbf16>, vector<128x128xbf16>, vector<16x128xf32> -> vector<16x128xf32>
    %c4_32 = arith.constant 4 : index
    %c0_33 = arith.constant 0 : index
    %c0_34 = arith.constant 0 : index
    %54 = vector.load %arg3[%c4_32, %c0_33, %c0_34] : memref<6x1x128xf32, #tpu.memory_space<vmem>>, vector<1x1x128xf32>
    %55 = vector.shape_cast %54 : vector<1x1x128xf32> to vector<1x128xf32>
    %56 = vector.broadcast %55 : vector<1x128xf32> to vector<16x128xf32>
    %57 = arith.addf %53, %56 : vector<16x128xf32>
    %cst_35 = arith.constant 0.000000e+00 : f32
    %58 = vector.broadcast %cst_35 : f32 to vector<16x128xf32>
    %59 = arith.maximumf %57, %58 : vector<16x128xf32>
    %60 = arith.truncf %59 : vector<16x128xf32> to vector<16x128xbf16>
    %c5 = arith.constant 5 : index
    %c0_36 = arith.constant 0 : index
    %c0_37 = arith.constant 0 : index
    %61 = vector.load %arg2[%c5, %c0_36, %c0_37] : memref<6x128x128xbf16, #tpu.memory_space<vmem>>, vector<1x128x128xbf16>
    %62 = vector.shape_cast %61 : vector<1x128x128xbf16> to vector<128x128xbf16>
    %cst_38 = arith.constant dense<0.000000e+00> : vector<16x128xf32>
    %63 = tpu.matmul %60, %62, %cst_38 {dimension_numbers = #tpu.dot_dimension_numbers<[1], [0], [0], [1], [0, 0, 1, 1], [], []>} : vector<16x128xbf16>, vector<128x128xbf16>, vector<16x128xf32> -> vector<16x128xf32>
    %c5_39 = arith.constant 5 : index
    %c0_40 = arith.constant 0 : index
    %c0_41 = arith.constant 0 : index
    %64 = vector.load %arg3[%c5_39, %c0_40, %c0_41] : memref<6x1x128xf32, #tpu.memory_space<vmem>>, vector<1x1x128xf32>
    %65 = vector.shape_cast %64 : vector<1x1x128xf32> to vector<1x128xf32>
    %66 = vector.broadcast %65 : vector<1x128xf32> to vector<16x128xf32>
    %67 = arith.addf %63, %66 : vector<16x128xf32>
    %68 = math.absf %67 : vector<16x128xf32>
    %cst_42 = arith.constant 0.000000e+00 : f32
    %69 = vector.broadcast %cst_42 : f32 to vector<16x128xf32>
    %70 = arith.subf %69, %68 : vector<16x128xf32>
    %71 = math.exp %70 : vector<16x128xf32>
    %cst_43 = arith.constant 1.000000e+00 : f32
    %72 = vector.broadcast %cst_43 : f32 to vector<16x128xf32>
    %73 = arith.addf %72, %71 : vector<16x128xf32>
    %74 = tpu.reciprocal %73 {approx = true} : vector<16x128xf32> -> vector<16x128xf32>
    %cst_44 = arith.constant 0.000000e+00 : f32
    %75 = vector.broadcast %cst_44 : f32 to vector<16x128xf32>
    %76 = arith.cmpf oge, %67, %75 : vector<16x128xf32>
    %77 = arith.mulf %71, %74 : vector<16x128xf32>
    %78 = arith.select %76, %74, %77 : vector<16x128xi1>, vector<16x128xf32>
    %c64_i32 = arith.constant 64 : i32
    %79 = vector.broadcast %c64_i32 : i32 to vector<16x128xi32>
    %80 = arith.cmpi slt, %28, %79 : vector<16x128xi32>
    %81 = arith.select %80, %78, %27 : vector<16x128xi1>, vector<16x128xf32>
    %c0_45 = arith.constant 0 : index
    %c0_46 = arith.constant 0 : index
    %82 = vector.load %arg4[%c0_45, %c0_46] : memref<16x128xf32, #tpu.memory_space<vmem>>, vector<16x128xf32>
    tpu.vector_store %arg4[%c0_45, %c0_46], %81 {strides = array<i32>} : memref<16x128xf32, #tpu.memory_space<vmem>>, vector<16x128xf32>,
    return
  }
  func.func @transform_0(%arg0: i32) -> (i32, i32) {
    %c0_i32 = arith.constant 0 : i32
    %c0_i32_0 = arith.constant 0 : i32
    return %arg0, %c0_i32 : i32, i32
  }
  func.func @transform_1(%arg0: i32) -> (i32, i32, i32) {
    %c0_i32 = arith.constant 0 : i32
    %c0_i32_0 = arith.constant 0 : i32
    %c0_i32_1 = arith.constant 0 : i32
    %c0_i32_2 = arith.constant 0 : i32
    return %c0_i32, %c0_i32_0, %c0_i32_1 : i32, i32, i32
  }
  func.func @transform_2(%arg0: i32) -> (i32, i32, i32) {
    %c0_i32 = arith.constant 0 : i32
    %c0_i32_0 = arith.constant 0 : i32
    %c0_i32_1 = arith.constant 0 : i32
    %c0_i32_2 = arith.constant 0 : i32
    return %c0_i32, %c0_i32_0, %c0_i32_1 : i32, i32, i32
  }
  func.func @transform_3(%arg0: i32) -> (i32, i32) {
    %c0_i32 = arith.constant 0 : i32
    %c0_i32_0 = arith.constant 0 : i32
    return %arg0, %c0_i32 : i32, i32
  }
}

</mosaic_0001>

<bundles_post_ra>
// kernel: vae_forward.1
= control target key start
LH: loop header
LB: loop body
LE: loop exit
PB: predicated region body
PF: predicated region fallthrough
CT: control target
= control target key end

     0   :  { %8 = vsyncpa [#allocation3], 0  ;;  %s1100_s12 = smov [#allocation2]   ;;  %s1235_s0 = inlined_call_operand.vmem [shape: bf16[16,128], index: 0, kind: input, shape index: {}]   ;;  %s1236_s1 = inlined_call_operand.hbm [shape: bf16[6,128,128], index: 1, kind: input, shape index: {}]   ;;  %s1237_s2 = inlined_call_operand.vmem [shape: f32[6,1,128], index: 2, kind: input, shape index: {}]   ;;  %s1238_s3 = inlined_call_operand.vmem [shape: f32[16,128], index: 3, kind: output, shape index: {}]  }
   0x1   :  { %s16_s13 = sshll.u32 %s1100_s12, 4  ;;  %s17_s13 = int_to_ptr.vmem [resolvable:$true] %s16_s13 }
   0x2   :  { %s1086_s14 = scalar_lea.vmem %s17_s13, 6144  ;;  %p1091_p1 = scmp.lt.s32.totalorder %s17_s13, %s17_s13 }
   0x3   :  { %p1087_p0 = scmp.ne.s32.totalorder %s17_s13, %s1086_s14  ;;  %p1092_p2 = scmp.lt.s32.totalorder %s1086_s14, %s1086_s14 }
   0x5   :  { %p1093_p3 = por %p1092_p2, %p1091_p1 }
   0x7   :  { %p1094_p4 = pnand %p1093_p3, %p1087_p0 }
   0x9   :  { %1097 = shalt.err (!%p1094_p4)
}
   0xa   :  { %s1101_s15 = smov 64   ;;  %s1102_s16 = smov 4  }
   0xb   :  { %22 = dma.hbm_to_vmem [thread:$0]  %s1236_s1, 6144, %s17_s13, [#allocation3], %s1101_s15, %s1101_s15, %s1102_s16  }
   0xc   :  { %1098 = dma.done.wait [#allocation3], 6144  }
   0xd   :  { %1099 = vsyncadd [#allocation3], 4294961152  ;;  %v1103_v0 = vmov 0.0   ;;  %vm1104_vm0 = vmmov 0   ;;  %v1016_v1 = vld [vmem:[#allocation2 + $0x38] sm:$0xff]   ;;  %v1017_v2 = vld [vmem:[#allocation2 + $0x30] sm:$0xff]  }
   0xe   :  { %891 = vmatprep.subr.bf16.mxu0 %v1103_v0  ;;  %907 = vmatprep.mubr.msk.bf16.mxu0 %vm1104_vm0, %v1103_v0  ;;  %v1018_v3 = vld [vmem:[#allocation2 + $0x28] sm:$0xff]   ;;  %v1025_v4 = vld [vmem:[#allocation2 + $0x78] sm:$0xff]   ;;  %v1019_v5 = vld [vmem:[#allocation2 + $0x20] sm:$0xff]  }
   0xf   :  { %911 = vmatprep.subr.bf16.mxu1 %v1103_v0  ;;  %927 = vmatprep.mubr.msk.bf16.mxu1 %vm1104_vm0, %v1103_v0  ;;  %v1026_v6 = vld [vmem:[#allocation2 + $0x70] sm:$0xff]   ;;  %v1020_v7 = vld [vmem:[#allocation2 + $0x18] sm:$0xff]   ;;  %v1027_v8 = vld [vmem:[#allocation2 + $0x68] sm:$0xff]  }
  0x10   :  { %892 = vmatpush3.bf16.msra.mxu0 %v1016_v1  ;;  %912 = vmatpush3.bf16.msra.mxu1 %v1025_v4  ;;  %v1021_v9 = vld [vmem:[#allocation2 + $0x10] sm:$0xff]   ;;  %v1028_v10 = vld [vmem:[#allocation2 + $0x60] sm:$0xff]   ;;  %v1022_v11 = vld [vmem:[#allocation2 + $0x8] sm:$0xff]  }
  0x11   :  { %893 = vmatprep.subr.bf16.mxu0 %v1103_v0  ;;  %913 = vmatprep.subr.bf16.mxu1 %v1103_v0  ;;  %v1029_v12 = vld [vmem:[#allocation2 + $0x58] sm:$0xff]   ;;  %v1023_v13 = vld [vmem:[#allocation2] sm:$0xff]   ;;  %v1030_v15 = vld [vmem:[#allocation2 + $0x50] sm:$0xff]  }
  0x12   :  { %v1146_v14 = vld [vmem:[%s1235_s0] sm:$0xff]   ;;  %v1031_v16 = vld [vmem:[#allocation2 + $0x48] sm:$0xff]   ;;  %v1033_v18 = vld [vmem:[#allocation2 + $0xb8] sm:$0xff]  }
  0x13   :  { %v1032_v17 = vld [vmem:[#allocation2 + $0x40] sm:$0xff]   ;;  %v1034_v19 = vld [vmem:[#allocation2 + $0xb0] sm:$0xff]   ;;  %v1035_v20 = vld [vmem:[#allocation2 + $0xa8] sm:$0xff]  }
  0x14   :  { %894 = vmatpush3.bf16.msra.mxu0 %v1017_v2  ;;  %914 = vmatpush3.bf16.msra.mxu1 %v1026_v6  ;;  %v1036_v21 = vld [vmem:[#allocation2 + $0xa0] sm:$0xff]   ;;  %v1037_v22 = vld [vmem:[#allocation2 + $0x98] sm:$0xff]   ;;  %v1038_v33 = vld [vmem:[#allocation2 + $0x90] sm:$0xff]  }
  0x15   :  { %895 = vmatprep.subr.bf16.mxu0 %v1103_v0  ;;  %915 = vmatprep.subr.bf16.mxu1 %v1103_v0  ;;  %v777_v23 = vld [vmem:[%s1237_s2] ss:$0 sm:$0xff]  ;;  %v1039_v34 = vld [vmem:[#allocation2 + $0x88] sm:$0xff]   ;;  %v1041_v36 = vld [vmem:[#allocation2 + $0xf8] sm:$0xff]  }
  0x16   :  { %v1040_v35 = vld [vmem:[#allocation2 + $0x80] sm:$0xff]   ;;  %v1042_v47 = vld [vmem:[#allocation2 + $0xf0] sm:$0xff]   ;;  %v1043_v48 = vld [vmem:[#allocation2 + $0xe8] sm:$0xff]  }
  0x17   :  { %v788_v37 = vld [vmem:[%s1237_s2 + $0x1] ss:$0 sm:$0xff]  ;;  %v1045_v50 = vld [vmem:[#allocation2 + $0xd8] sm:$0xff]   ;;  %v1046_v51 = vld [vmem:[#allocation2 + $0xd0] sm:$0xff]  }
  0x18   :  { %896 = vmatpush3.bf16.msra.mxu0 %v1018_v3  ;;  %916 = vmatpush3.bf16.msra.mxu1 %v1027_v8  ;;  %v1044_v49 = vld [vmem:[#allocation2 + $0xe0] sm:$0xff]   ;;  %v1047_v52 = vld [vmem:[#allocation2 + $0xc8] sm:$0xff]   ;;  %v1049_v54 = vld [vmem:[#allocation2 + $0x138] sm:$0xff]  }
  0x19   :  { %897 = vmatprep.subr.bf16.mxu0 %v1103_v0  ;;  %917 = vmatprep.subr.bf16.mxu1 %v1103_v0  ;;  %v1048_v53 = vld [vmem:[#allocation2 + $0xc0] sm:$0xff]   ;;  %v1050_v55 = vld [vmem:[#allocation2 + $0x130] sm:$0xff]   ;;  %v1051_v56 = vld [vmem:[#allocation2 + $0x128] sm:$0xff]  }
  0x1a   :  { %v1052_v57 = vld [vmem:[#allocation2 + $0x120] sm:$0xff]   ;;  %v1053_v58 = vld [vmem:[#allocation2 + $0x118] sm:$0xff]  }
  0x1b   :  { %v798_v59 = vld [vmem:[%s1237_s2 + $0x2] ss:$0 sm:$0xff] }
  0x1c   :  { %898 = vmatpush3.bf16.msra.mxu0 %v1019_v5  ;;  %918 = vmatpush3.bf16.msra.mxu1 %v1028_v10 }
  0x1d   :  { %899 = vmatprep.subr.bf16.mxu0 %v1103_v0  ;;  %919 = vmatprep.subr.bf16.mxu1 %v1103_v0 }
  0x20   :  { %900 = vmatpush3.bf16.msra.mxu0 %v1020_v7  ;;  %920 = vmatpush3.bf16.msra.mxu1 %v1029_v12  ;;  %v383_v7 = vlaneseq }
  0x21   :  { %901 = vmatprep.subr.bf16.mxu0 %v1103_v0  ;;  %921 = vmatprep.subr.bf16.mxu1 %v1103_v0 }
  0x22   :  { %v1198_v8 = vand.u32 127, %v383_v7 }
  0x24   :  { %902 = vmatpush3.bf16.msra.mxu0 %v1021_v9  ;;  %922 = vmatpush3.bf16.msra.mxu1 %v1030_v15  ;;  %v385_v9 = vunpack.c.l.bf16 %v1146_v14  ;;  %vm395_vm1 = vcmp.ge.s32.totalorder %v1198_v8, 72  ;;  %vm396_vm2 = vcmp.lt.s32.totalorder %v1198_v8, 80  ;;  %vm767_vm4 = vcmp.lt.s32.totalorder %v1198_v8, 64 }
  0x25   :  { %903 = vmatprep.subr.bf16.mxu0 %v1103_v0  ;;  %923 = vmatprep.subr.bf16.mxu1 %v1103_v0  ;;  %vm397_vm3 = vmand %vm395_vm1, %vm396_vm2 }
  0x28   :  { %904 = vmatpush3.bf16.msra.mxu0 %v1022_v11  ;;  %924 = vmatpush3.bf16.msra.mxu1 %v1031_v16  ;;  %v386_v11 = vunpack.c.h.bf16 %v1146_v14 }
  0x29   :  { %905 = vmatprep.subr.bf16.mxu0 %v1103_v0  ;;  %925 = vmatprep.subr.bf16.mxu1 %v1103_v0 }
  0x2c   :  { %906 = vmatpush3.bf16.msra.mxu0 %v1023_v13  ;;  %926 = vmatpush3.bf16.msra.mxu1 %v1032_v17 }
  0x2d   :  { %931 = vmatprep.subr.bf16.mxu0 %v1103_v0  ;;  %951 = vmatprep.subr.bf16.mxu1 %v1103_v0 }
  0x2f   :  { %908 = vmatmul.mubr.bf16.vlgmr.msra.gmra.mxu0 %v1146_v14  ;;  %v1055_v14 = vld [vmem:[#allocation2 + $0x108] sm:$0xff]  }
  0x30   :  { %947 = vmatprep.mubr.msk.bf16.mxu0 %vm1104_vm0, %v1103_v0  ;;  %932 = vmatpush3.bf16.msra.mxu0 %v1033_v18 }
  0x31   :  { %933 = vmatprep.subr.bf16.mxu0 %v1103_v0 }
  0x34   :  { %934 = vmatpush3.bf16.msra.mxu0 %v1034_v19  ;;  %v1054_v19 = vld [vmem:[#allocation2 + $0x110] sm:$0xff]  }
  0x35   :  { %935 = vmatprep.subr.bf16.mxu0 %v1103_v0 }
  0x38   :  { %936 = vmatpush3.bf16.msra.mxu0 %v1035_v20  ;;  %v1056_v20 = vld [vmem:[#allocation2 + $0x100] sm:$0xff]  }
  0x39   :  { %937 = vmatprep.subr.bf16.mxu0 %v1103_v0 }
  0x3c   :  { %938 = vmatpush3.bf16.msra.mxu0 %v1036_v21  ;;  %v1057_v21 = vld [vmem:[#allocation2 + $0x178] sm:$0xff]  }
  0x3d   :  { %939 = vmatprep.subr.bf16.mxu0 %v1103_v0 }
  0x40   :  { %940 = vmatpush3.bf16.msra.mxu0 %v1037_v22  ;;  %v1058_v22 = vld [vmem:[#allocation2 + $0x170] sm:$0xff]  }
  0x41   :  { %941 = vmatprep.subr.bf16.mxu0 %v1103_v0 }
  0x44   :  { %942 = vmatpush3.bf16.msra.mxu0 %v1038_v33 }
  0x45   :  { %943 = vmatprep.subr.bf16.mxu0 %v1103_v0 }
  0x48   :  { %944 = vmatpush3.bf16.msra.mxu0 %v1039_v34 }
  0x49   :  { %945 = vmatprep.subr.bf16.mxu0 %v1103_v0 }
  0x4c   :  { %946 = vmatpush3.bf16.msra.mxu0 %v1040_v35 }
  0x4d   :  { %971 = vmatprep.subr.bf16.mxu0 %v1103_v0 }
  0xef   :  { %v142_v24 = vpop.f32.mrf.mxu0 }
  0xf0   :  { %v143_v26 = vadd.f32 %v777_v23, %v142_v24  ;;  %v1060_v24 = vld [vmem:[#allocation2 + $0x160] sm:$0xff]  }
  0xf1   :  { %v909_v25 = vpop.f32.mrf.mxu0 }
  0xf2   :  { %v149_v30 = vmax.f32 %v143_v26, 0.0  ;;  %v1061_v25 = vld [vmem:[#allocation2 + $0x158] sm:$0xff]   ;;  %v808_v26 = vld [vmem:[%s1237_s2 + $0x3] ss:$0 sm:$0xff] }
  0xf3   :  { %v145_v27 = vpop.f32.mrf.mxu0 }
  0xf4   :  { %v146_v28 = vadd.f32 %v777_v23, %v145_v27  ;;  %v1059_v23 = vld [vmem:[#allocation2 + $0x168] sm:$0xff]  }
  0xf5   :  { %v910_v29 = vpop.f32.mrf.mxu0 }
  0xf6   :  { %v150_v31 = vmax.f32 %v146_v28, 0.0 }
  0xf8   :  { %v151_v32 = vpack.c.bf16 %v150_v31, %v149_v30 }
  0xfa   :  { %928 = vmatmul.mubr.bf16.vlgmr.msra.gmra.mxu1 %v151_v32 }
  0xfb   :  { %967 = vmatprep.mubr.msk.bf16.mxu1 %vm1104_vm0, %v1103_v0  ;;  %952 = vmatpush3.bf16.msra.mxu1 %v1041_v36  ;;  %v1062_v36 = vld [vmem:[#allocation2 + $0x150] sm:$0xff]  }
  0xfc   :  { %953 = vmatprep.subr.bf16.mxu1 %v1103_v0 }
  0xff   :  { %954 = vmatpush3.bf16.msra.mxu1 %v1042_v47 }
 0x100   :  { %955 = vmatprep.subr.bf16.mxu1 %v1103_v0 }
 0x103   :  { %956 = vmatpush3.bf16.msra.mxu1 %v1043_v48 }
 0x104   :  { %957 = vmatprep.subr.bf16.mxu1 %v1103_v0 }
 0x107   :  { %958 = vmatpush3.bf16.msra.mxu1 %v1044_v49 }
 0x108   :  { %959 = vmatprep.subr.bf16.mxu1 %v1103_v0 }
 0x10b   :  { %960 = vmatpush3.bf16.msra.mxu1 %v1045_v50 }
 0x10c   :  { %961 = vmatprep.subr.bf16.mxu1 %v1103_v0 }
 0x10f   :  { %962 = vmatpush3.bf16.msra.mxu1 %v1046_v51 }
 0x110   :  { %963 = vmatprep.subr.bf16.mxu1 %v1103_v0 }
 0x113   :  { %964 = vmatpush3.bf16.msra.mxu1 %v1047_v52 }
 0x114   :  { %965 = vmatprep.subr.bf16.mxu1 %v1103_v0 }
 0x117   :  { %966 = vmatpush3.bf16.msra.mxu1 %v1048_v53 }
 0x118   :  { %991 = vmatprep.subr.bf16.mxu1 %v1103_v0 }
 0x1ba   :  { %v259_v38 = vpop.f32.mrf.mxu1 }
 0x1bb   :  { %v260_v40 = vadd.f32 %v788_v37, %v259_v38  ;;  %v1064_v38 = vld [vmem:[#allocation2 + $0x140] sm:$0xff]  }
 0x1bc   :  { %v929_v39 = vpop.f32.mrf.mxu1 }
 0x1bd   :  { %v266_v44 = vmax.f32 %v260_v40, 0.0  ;;  %v818_v39 = vld [vmem:[%s1237_s2 + $0x4] ss:$0 sm:$0xff] }
 0x1be   :  { %v262_v41 = vpop.f32.mrf.mxu1 }
 0x1bf   :  { %v263_v42 = vadd.f32 %v788_v37, %v262_v41  ;;  %v1063_v37 = vld [vmem:[#allocation2 + $0x148] sm:$0xff]  }
 0x1c0   :  { %v930_v43 = vpop.f32.mrf.mxu1 }
 0x1c1   :  { %v267_v45 = vmax.f32 %v263_v42, 0.0 }
 0x1c3   :  { %v268_v46 = vpack.c.bf16 %v267_v45, %v266_v44 }
 0x1c5   :  { %948 = vmatmul.mubr.bf16.vlgmr.msra.gmra.mxu0 %v268_v46 }
 0x1c6   :  { %987 = vmatprep.mubr.msk.bf16.mxu0 %vm1104_vm0, %v1103_v0  ;;  %972 = vmatpush3.bf16.msra.mxu0 %v1049_v54 }
 0x1c7   :  { %973 = vmatprep.subr.bf16.mxu0 %v1103_v0 }
 0x1ca   :  { %974 = vmatpush3.bf16.msra.mxu0 %v1050_v55 }
 0x1cb   :  { %975 = vmatprep.subr.bf16.mxu0 %v1103_v0 }
 0x1ce   :  { %976 = vmatpush3.bf16.msra.mxu0 %v1051_v56 }
 0x1cf   :  { %977 = vmatprep.subr.bf16.mxu0 %v1103_v0 }
 0x1d2   :  { %978 = vmatpush3.bf16.msra.mxu0 %v1052_v57 }
 0x1d3   :  { %979 = vmatprep.subr.bf16.mxu0 %v1103_v0 }
 0x1d6   :  { %980 = vmatpush3.bf16.msra.mxu0 %v1053_v58 }
 0x1d7   :  { %981 = vmatprep.subr.bf16.mxu0 %v1103_v0 }
 0x1da   :  { %982 = vmatpush3.bf16.msra.mxu0 %v1054_v19 }
 0x1db   :  { %983 = vmatprep.subr.bf16.mxu0 %v1103_v0 }
 0x1de   :  { %984 = vmatpush3.bf16.msra.mxu0 %v1055_v14 }
 0x1df   :  { %985 = vmatprep.subr.bf16.mxu0 %v1103_v0 }
 0x1e2   :  { %986 = vmatpush3.bf16.msra.mxu0 %v1056_v20 }
 0x285   :  { %v376_v60 = vpop.f32.mrf.mxu0 }
 0x286   :  { %v1192_v61 = vadd.f32 %v798_v59, %v376_v60 }
 0x287   :  { %v949_v62 = vpop.f32.mrf.mxu0 }
 0x288   :  { %v387_v63 = vmul.f32 0.5, %v1192_v61 }
 0x289   :  { %v379_v1 = vpop.f32.mrf.mxu0 }
 0x28a   :  { %v389_v2 = vmul.f32 1.442695, %v387_v63  ;;  %v1195_v3 = vadd.f32 %v798_v59, %v379_v1 }
 0x28b   :  { %v950_v4 = vpop.f32.mrf.mxu0 }
 0x28c   :  { %1066 = vpow2.f32 %v389_v2  ;;  %v388_v5 = vmul.f32 0.5, %v1195_v3 }
 0x28e   :  { %v391_v6 = vmul.f32 1.442695, %v388_v5 }
 0x290   :  { %1068 = vpow2.f32 %v391_v6 }
 0x299   :  { %v1067_v10 = vpop.eup %1066 }
 0x29a   :  { %v393_v12 = vmul.f32 %v1067_v10, %v385_v9 }
 0x29c   :  { %v398_v16 = vsel %vm397_vm3, %v393_v12, %v1192_v61 }
 0x29d   :  { %v1069_v13 = vpop.eup %1068 }
 0x29e   :  { %v394_v15 = vmul.f32 %v1069_v13, %v386_v11 }
 0x2a0   :  { %v399_v17 = vsel %vm397_vm3, %v394_v15, %v1195_v3 }
 0x2a1   :  { %v400_v18 = vpack.c.bf16 %v399_v17, %v398_v16 }
 0x2a3   :  { %968 = vmatmul.mubr.bf16.vlgmr.msra.gmra.mxu1 %v400_v18 }
 0x2a4   :  { %1007 = vmatprep.mubr.msk.bf16.mxu1 %vm1104_vm0, %v1103_v0  ;;  %992 = vmatpush3.bf16.msra.mxu1 %v1057_v21 }
 0x2a5   :  { %993 = vmatprep.subr.bf16.mxu1 %v1103_v0 }
 0x2a8   :  { %994 = vmatpush3.bf16.msra.mxu1 %v1058_v22 }
 0x2a9   :  { %995 = vmatprep.subr.bf16.mxu1 %v1103_v0 }
 0x2ac   :  { %996 = vmatpush3.bf16.msra.mxu1 %v1059_v23 }
 0x2ad   :  { %997 = vmatprep.subr.bf16.mxu1 %v1103_v0 }
 0x2b0   :  { %998 = vmatpush3.bf16.msra.mxu1 %v1060_v24 }
 0x2b1   :  { %999 = vmatprep.subr.bf16.mxu1 %v1103_v0 }
 0x2b4   :  { %1000 = vmatpush3.bf16.msra.mxu1 %v1061_v25 }
 0x2b5   :  { %1001 = vmatprep.subr.bf16.mxu1 %v1103_v0 }
 0x2b8   :  { %1002 = vmatpush3.bf16.msra.mxu1 %v1062_v36 }
 0x2b9   :  { %1003 = vmatprep.subr.bf16.mxu1 %v1103_v0 }
 0x2bc   :  { %1004 = vmatpush3.bf16.msra.mxu1 %v1063_v37 }
 0x2bd   :  { %1005 = vmatprep.subr.bf16.mxu1 %v1103_v0  ;;  %v828_v0 = vld [vmem:[%s1237_s2 + $0x5] ss:$0 sm:$0xff] }
 0x2c0   :  { %1006 = vmatpush3.bf16.msra.mxu1 %v1064_v38 }
 0x363   :  { %v508_v27 = vpop.f32.mrf.mxu1 }
 0x364   :  { %v509_v29 = vadd.f32 %v808_v26, %v508_v27 }
 0x365   :  { %v969_v28 = vpop.f32.mrf.mxu1 }
 0x366   :  { %v515_v33 = vmax.f32 %v509_v29, 0.0 }
 0x367   :  { %v511_v30 = vpop.f32.mrf.mxu1 }
 0x368   :  { %v512_v31 = vadd.f32 %v808_v26, %v511_v30 }
 0x369   :  { %v970_v32 = vpop.f32.mrf.mxu1 }
 0x36a   :  { %v516_v34 = vmax.f32 %v512_v31, 0.0 }
 0x36c   :  { %v517_v35 = vpack.c.bf16 %v516_v34, %v515_v33 }
 0x36e   :  { %988 = vmatmul.mubr.bf16.vlgmr.msra.gmra.mxu0 %v517_v35 }
 0x42e   :  { %v625_v40 = vpop.f32.mrf.mxu0 }
 0x42f   :  { %v626_v42 = vadd.f32 %v818_v39, %v625_v40 }
 0x430   :  { %v989_v41 = vpop.f32.mrf.mxu0 }
 0x431   :  { %v632_v46 = vmax.f32 %v626_v42, 0.0 }
 0x432   :  { %v628_v43 = vpop.f32.mrf.mxu0 }
 0x433   :  { %v629_v44 = vadd.f32 %v818_v39, %v628_v43 }
 0x434   :  { %v990_v45 = vpop.f32.mrf.mxu0 }
 0x435   :  { %v633_v47 = vmax.f32 %v629_v44, 0.0 }
 0x437   :  { %v634_v48 = vpack.c.bf16 %v633_v47, %v632_v46 }
 0x439   :  { %1008 = vmatmul.mubr.bf16.vlgmr.msra.gmra.mxu1 %v634_v48 }
 0x4f9   :  { %v742_v49 = vpop.f32.mrf.mxu1 }
 0x4fa   :  { %v743_v50 = vadd.f32 %v828_v0, %v742_v49 }
 0x4fb   :  { %v1009_v51 = vpop.f32.mrf.mxu1 }
 0x4fc   :  { %v749_v52 = vand.u32 2147483647, %v743_v50  ;;  %vm761_vm5 = vcmp.ge.f32.partialorder %v743_v50, 0.0 }
 0x4fd   :  { %v745_v53 = vpop.f32.mrf.mxu1 }
 0x4fe   :  { %v751_v54 = vsub.f32 0.0, %v749_v52  ;;  %v746_v55 = vadd.f32 %v828_v0, %v745_v53 }
 0x4ff   :  { %v1010_v56 = vpop.f32.mrf.mxu1 }
 0x500   :  { %v753_v57 = vmul.f32 1.442695, %v751_v54  ;;  %v750_v58 = vand.u32 2147483647, %v746_v55  ;;  %vm762_vm6 = vcmp.ge.f32.partialorder %v746_v55, 0.0 }
 0x502   :  { %1070 = vpow2.f32 %v753_v57  ;;  %v752_v59 = vsub.f32 0.0, %v750_v58 }
 0x504   :  { %v755_v60 = vmul.f32 1.442695, %v752_v59 }
 0x506   :  { %1072 = vpow2.f32 %v755_v60 }
 0x50f   :  { %v1071_v62 = vpop.eup %1070 }
 0x510   :  { %v757_v63 = vadd.f32 1.0, %v1071_v62 }
 0x512   :  { %1074 = vrcp.f32 %v757_v63 }
 0x513   :  { %v1073_v1 = vpop.eup %1072 }
 0x514   :  { %v758_v2 = vadd.f32 1.0, %v1073_v1 }
 0x516   :  { %1076 = vrcp.f32 %v758_v2 }
 0x51f   :  { %v1075_v4 = vpop.eup %1074 }
 0x520   :  { %v763_v5 = vmul.f32 %v1075_v4, %v1071_v62 }
 0x522   :  { %v765_v6 = vsel %vm761_vm5, %v1075_v4, %v763_v5 }
 0x523   :  { %v1077_v7 = vpop.eup %1076  ;;  %v768_v9 = vsel %vm767_vm4, %v765_v6, %v1192_v61 }
 0x524   :  { %770 = vst [vmem:[%s1238_s3] sm:$0xff] %v768_v9  ;;  %v764_v10 = vmul.f32 %v1077_v7, %v1073_v1 }
 0x526   :  { %v766_v11 = vsel %vm762_vm6, %v1077_v7, %v764_v10 }
 0x527   :  { %v769_v12 = vsel %vm767_vm4, %v766_v11, %v1195_v3 }
 0x528   :  { %771 = vst [vmem:[%s1238_s3 + $0x8] sm:$0xff] %v769_v12 }
 0x529   :  { %776 = vsyncpa [#allocation3], 1 }

</bundles_post_ra>
